<compile_context>
chip_gen: v7x
topology: tpu7x:2x2x1
jax: 0.10.0
libtpu: 0.0.40
codegen_flags: <defaults>
</compile_context>

<pallas_src>
import jax
import jax.numpy as jnp
from jax.experimental import pallas as pl
from jax.experimental.pallas import tpu as pltpu


def _round_up(x, m):
    return ((x + m - 1) // m) * m


def _tpu_generation_params():
    """Return (tm_target, vmem_capacity_bytes) for the attached TPU generation."""
    kind = ""
    try:
        kind = jax.devices()[0].device_kind.lower()
    except Exception:
        pass
    try:
        vmem_cap = int(pltpu.get_tpu_info().vmem_capacity_bytes)
    except Exception:
        vmem_cap = (64 << 20) if "v7" in kind else (128 << 20)
    if "v6" in kind:
        tm_target = 1024      # 128 MiB VMEM; HBM roofline knee ~650 flop/byte
    elif "v7" in kind:
        tm_target = 512       # 64 MiB VMEM/TC; knee ~310 flop/byte; >=2 blocks for M>512
    else:                     # v5e and unknown chips
        tm_target = 512       # knee ~240 flop/byte
    return tm_target, vmem_cap


def _pick_tff(dff, target):
    """Largest multiple-of-128 divisor of dff not exceeding target (else full dff)."""
    if dff <= target:
        return dff
    t = (target // 128) * 128
    while t >= 128:
        if dff % t == 0:
            return t
        t -= 128
    return dff


def _vmem_bytes(tm, tff, d, dff, dout, in_isz, out_isz):
    """Double-buffered working set: 2x each streamed block + resident f32 acc."""
    kt = dff // tff
    b = 2 * tm * d * in_isz                     # x row tile
    b += 2 * (d * tff + tff) * in_isz           # W1 column slice + b1 slice
    b += 2 * (tff * dout + dout) * in_isz       # W2 row slice + b2
    b += 2 * tm * dout * out_isz                # output tile
    b += tm * dout * 4 if kt > 1 else 0         # f32 accumulator (multi-k only)
    return b


def ffn_kernel_acc(x_ref, w1_ref, b1_ref, w2_ref, b2_ref, o_ref, acc_ref):
    """Multi-step Dff reduction: accumulate partial fc2 products in f32 VMEM."""
    k = pl.program_id(1)

    @pl.when(k == 0)
    def _init():
        acc_ref[...] = jnp.zeros_like(acc_ref)

    # fc1 column slice -> bias -> ReLU (exact per-tff tile), then partial fc2.
    h = jnp.dot(x_ref[...], w1_ref[...], preferred_element_type=jnp.float32)
    h = jnp.maximum(h + b1_ref[...].astype(jnp.float32), 0.0)
    acc_ref[...] += jnp.dot(h.astype(w2_ref.dtype), w2_ref[...],
                            preferred_element_type=jnp.float32)

    @pl.when(k == pl.num_programs(1) - 1)
    def _finalize():
        # Re-read x_ref here (instead of reusing the fc1 operand) so that value's
        # live range ends right after the first matmul.
        out = (acc_ref[...] + b2_ref[...].astype(jnp.float32)
               + x_ref[...].astype(jnp.float32))
        o_ref[...] = out.astype(o_ref.dtype)


def ffn_kernel_single(x_ref, w1_ref, b1_ref, w2_ref, b2_ref, o_ref):
    """Single Dff step: no scratch accumulator, no init/finalize phases."""
    h = jnp.dot(x_ref[...], w1_ref[...], preferred_element_type=jnp.float32)
    h = jnp.maximum(h + b1_ref[...].astype(jnp.float32), 0.0)
    out = jnp.dot(h.astype(w2_ref.dtype), w2_ref[...],
                  preferred_element_type=jnp.float32)
    out = out + b2_ref[...].astype(jnp.float32) + x_ref[...].astype(jnp.float32)
    o_ref[...] = out.astype(o_ref.dtype)


def ffn_pallas(x, w1, b1, w2, b2, *, compute_dtype=jnp.bfloat16, tm=None, tff=512):
    """x: [M, D]; w1: [D, Dff]; b1: [Dff]; w2: [Dff, Dout]; b2: [Dout].

    Weights are stored [in, out] (transpose of nn.Linear.weight).  Operands are
    cast to `compute_dtype` (bf16 by default, MXU-native); accumulation is f32.
    """
    M, D = x.shape
    Dff = w1.shape[1]
    Dout = w2.shape[1]
    assert w1.shape[0] == D and w2.shape[0] == Dff
    # Identity residual requires output_dim == embed_dim (module default).
    assert Dout == D, "add_identity=True requires output_dim == embed_dim"

    out_dtype = x.dtype
    if compute_dtype is not None:
        x = x.astype(compute_dtype)
        w1 = w1.astype(compute_dtype)
        b1 = b1.astype(compute_dtype)
        w2 = w2.astype(compute_dtype)
        b2 = b2.astype(compute_dtype)

    b1 = b1.reshape(1, Dff)
    b2 = b2.reshape(1, Dout)

    in_isz = jnp.dtype(x.dtype).itemsize
    out_isz = jnp.dtype(out_dtype).itemsize
    gran = 16 if in_isz <= 2 else 8        # bf16 row tiles: >=16 sublanes

    tm_target, vmem_cap = _tpu_generation_params()
    if tm is None:
        tm = tm_target
    tff = _pick_tff(Dff, tff)

    # Row tile: shrink for tiny problems, keep it sublane/MXU aligned.
    tm = max(gran, min(tm, _round_up(M, gran)))

    # Fit the double-buffered working set in ~80% of this generation's VMEM;
    # shrink tff before tm so the weight-stream arithmetic intensity (~tm flop/B)
    # stays above the HBM roofline knee (esp. on v7x's 64 MiB VMEM).
    budget = int(vmem_cap * 0.8)
    while _vmem_bytes(tm, tff, D, Dff, Dout, in_isz, out_isz) > budget:
        if tff >= 256 and tff % 256 == 0:
            tff //= 2
        elif tm >= 2 * gran and tm % (2 * gran) == 0:
            tm //= 2
        else:
            break

    M_pad = _round_up(M, tm)
    if M_pad != M:
        # Padded rows compute relu(b1) @ W2 garbage but are sliced off below.
        x = jnp.pad(x, ((0, M_pad - M), (0, 0)))

    n_i = M_pad // tm
    kt = Dff // tff

    need = _vmem_bytes(tm, tff, D, Dff, Dout, in_isz, out_isz)
    vmem_limit = int(min(vmem_cap, max(32 << 20, need + (4 << 20))))

    flops = 2 * M_pad * (D * Dff + Dff * Dout)
    # Weights (and biases) are re-streamed once per row block i.
    bytes_accessed = (M_pad * D * in_isz
                      + n_i * (D * Dff + Dff + Dff * Dout + Dout) * in_isz
                      + M_pad * Dout * out_isz)
    cost = pl.CostEstimate(flops=flops, transcendentals=0,
                           bytes_accessed=bytes_accessed)

    if kt == 1:
        # Whole Dff fits in one slice: skip the scratch accumulator entirely.
        kernel = ffn_kernel_single
        dim_sem = ("parallel",)
        grid_spec = pltpu.PrefetchScalarGridSpec(
            num_scalar_prefetch=0,
            grid=(n_i,),
            in_specs=[
                pl.BlockSpec((tm, D), lambda i: (i, 0)),       # x rows
                pl.BlockSpec((D, tff), lambda i: (0, 0)),      # full W1
                pl.BlockSpec((1, tff), lambda i: (0, 0)),      # b1
                pl.BlockSpec((tff, Dout), lambda i: (0, 0)),   # full W2
                pl.BlockSpec((1, Dout), lambda i: (0, 0)),     # b2
            ],
            out_specs=pl.BlockSpec((tm, Dout), lambda i: (i, 0)),
        )
    else:
        kernel = ffn_kernel_acc
        dim_sem = ("parallel", "arbitrary")
        grid_spec = pltpu.PrefetchScalarGridSpec(
            num_scalar_prefetch=0,
            grid=(n_i, kt),
            in_specs=[
                pl.BlockSpec((tm, D), lambda i, k: (i, 0)),      # x rows (resident over k)
                pl.BlockSpec((D, tff), lambda i, k: (0, k)),     # W1 column slice
                pl.BlockSpec((1, tff), lambda i, k: (0, k)),     # b1 slice
                pl.BlockSpec((tff, Dout), lambda i, k: (k, 0)),  # W2 row slice
                pl.BlockSpec((1, Dout), lambda i, k: (0, 0)),    # b2
            ],
            out_specs=pl.BlockSpec((tm, Dout), lambda i, k: (i, 0)),
            scratch_shapes=[pltpu.VMEM((tm, Dout), jnp.float32)],
        )

    out = pl.pallas_call(
        kernel,
        out_shape=jax.ShapeDtypeStruct((M_pad, Dout), out_dtype),
        grid_spec=grid_spec,
        compiler_params=pltpu.CompilerParams(
            dimension_semantics=dim_sem,
            vmem_limit_bytes=vmem_limit,
        ),
        cost_estimate=cost,
    )(x, w1, b1, w2, b2)

    return out[:M] if M_pad != M else out


def ffn_forward(x_bsd, w1, b1, w2, b2, *, compute_dtype=jnp.bfloat16):
    """x_bsd: [batch, seq, embed_dim] -> [batch, seq, embed_dim] (add_identity=True)."""
    B, S, D = x_bsd.shape
    out2d = ffn_pallas(x_bsd.reshape(B * S, D), w1, b1, w2, b2,
                       compute_dtype=compute_dtype)
    return out2d.reshape(B, S, D)


if __name__ == "__main__":
    # Module defaults: embed_dim=256, feedforward_dim=1024, output_dim=embed_dim.
    batch, seq = 2, 8
    embed_dim, feedforward_dim = 256, 1024

    key = jax.random.PRNGKey(0)
    k_x, k_w1, k_b1, k_w2, k_b2 = jax.random.split(key, 5)

    x = jax.random.normal(k_x, (batch, seq, embed_dim), dtype=jnp.float32)

    # Deterministic parameter init (uniform, Kaiming-like bounds a la nn.Linear).
    bound1 = 1.0 / (embed_dim ** 0.5)
    bound2 = 1.0 / (feedforward_dim ** 0.5)
    w1 = jax.random.uniform(k_w1, (embed_dim, feedforward_dim), jnp.float32,
                            -bound1, bound1)
    b1 = jax.random.uniform(k_b1, (feedforward_dim,), jnp.float32, -bound1, bound1)
    w2 = jax.random.uniform(k_w2, (feedforward_dim, embed_dim), jnp.float32,
                            -bound2, bound2)
    b2 = jax.random.uniform(k_b2, (embed_dim,), jnp.float32, -bound2, bound2)

    out = jax.block_until_ready(ffn_forward(x, w1, b1, w2, b2))

    # Pure-JAX f32 reference of the module forward (fc1 -> ReLU -> fc2 + identity).
    x2d = x.reshape(-1, embed_dim)
    h_ref = jnp.maximum(
        jnp.dot(x2d, w1, precision=jax.lax.Precision.HIGHEST) + b1, 0.0)
    ref2d = x2d + jnp.dot(h_ref, w2, precision=jax.lax.Precision.HIGHEST) + b2
    ref = ref2d.reshape(batch, seq, embed_dim)

    assert out.shape == x.shape
    # Kernel runs with bf16 operands + f32 accumulation; tolerance vs. the all-f32
    # reference reflects bf16 quantization of x / W1 / W2 / h (documented tradeoff).
    err = float(jnp.max(jnp.abs(out.astype(jnp.float32) - ref)))
    assert err < 7.5e-2, err

    print("KERNEL_OK")
</pallas_src>

<mosaic_0001>
module attributes {stable_mosaic.version = 11 : i64} {
  func.func @ffn_kernel_acc(%arg0: i32, %arg1: i32, %arg2: memref<16x256xbf16, #tpu.memory_space<vmem>>, %arg3: memref<256x512xbf16, #tpu.memory_space<vmem>>, %arg4: memref<1x512xbf16, #tpu.memory_space<vmem>>, %arg5: memref<512x256xbf16, #tpu.memory_space<vmem>>, %arg6: memref<1x256xbf16, #tpu.memory_space<vmem>>, %arg7: memref<16x256xf32, #tpu.memory_space<vmem>>, %arg8: memref<16x256xf32, #tpu.memory_space<vmem>>) attributes {dimension_semantics = [#tpu.dimension_semantics<parallel>, #tpu.dimension_semantics<arbitrary>], iteration_bounds = array<i64: 1, 2>, scalar_prefetch = 0 : i64, scratch_operands = 1 : i64, tpu.core_type = #tpu.core_type<tc>, window_params = [{transform_indices = @transform_0, window_bounds = array<i64: 16, 256>}, {transform_indices = @transform_1, window_bounds = array<i64: 256, 512>}, {transform_indices = @transform_2, window_bounds = array<i64: 1, 512>}, {transform_indices = @transform_3, window_bounds = array<i64: 512, 256>}, {pipeline_mode = #tpu.pipeline_mode<synchronous>, transform_indices = @transform_4, window_bounds = array<i64: 1, 256>}, {transform_indices = @transform_5, window_bounds = array<i64: 16, 256>}]} {
    %c0_i32 = arith.constant 0 : i32
    %0 = arith.cmpi eq, %arg1, %c0_i32 : i32
    %1 = arith.extui %0 : i1 to i32
    %c0_i32_0 = arith.constant 0 : i32
    %2 = arith.cmpi ne, %1, %c0_i32_0 : i32
    scf.if %2 {
      %cst_15 = arith.constant 0.000000e+00 : f32
      %21 = vector.broadcast %cst_15 : f32 to vector<16x256xf32>
      %c0_16 = arith.constant 0 : index
      %c0_17 = arith.constant 0 : index
      %22 = vector.load %arg8[%c0_16, %c0_17] : memref<16x256xf32, #tpu.memory_space<vmem>>, vector<16x256xf32>
      tpu.vector_store %arg8[%c0_16, %c0_17], %21 {strides = array<i32>} : memref<16x256xf32, #tpu.memory_space<vmem>>, vector<16x256xf32>,
    } else {
    }
    %c0 = arith.constant 0 : index
    %c0_1 = arith.constant 0 : index
    %3 = vector.load %arg2[%c0, %c0_1] : memref<16x256xbf16, #tpu.memory_space<vmem>>, vector<16x256xbf16>
    %c0_2 = arith.constant 0 : index
    %c0_3 = arith.constant 0 : index
    %4 = vector.load %arg3[%c0_2, %c0_3] : memref<256x512xbf16, #tpu.memory_space<vmem>>, vector<256x512xbf16>
    %cst = arith.constant dense<0.000000e+00> : vector<16x512xf32>
    %5 = tpu.matmul %3, %4, %cst {dimension_numbers = #tpu.dot_dimension_numbers<[1], [0], [0], [1], [0, 0, 1, 1], [], []>} : vector<16x256xbf16>, vector<256x512xbf16>, vector<16x512xf32> -> vector<16x512xf32>
    %c0_4 = arith.constant 0 : index
    %c0_5 = arith.constant 0 : index
    %6 = vector.load %arg4[%c0_4, %c0_5] : memref<1x512xbf16, #tpu.memory_space<vmem>>, vector<1x512xbf16>
    %7 = arith.extf %6 : vector<1x512xbf16> to vector<1x512xf32>
    %8 = vector.broadcast %7 : vector<1x512xf32> to vector<16x512xf32>
    %9 = arith.addf %5, %8 : vector<16x512xf32>
    %cst_6 = arith.constant 0.000000e+00 : f32
    %10 = vector.broadcast %cst_6 : f32 to vector<16x512xf32>
    %11 = arith.maximumf %9, %10 : vector<16x512xf32>
    %c0_7 = arith.constant 0 : index
    %c0_8 = arith.constant 0 : index
    %12 = vector.load %arg8[%c0_7, %c0_8] : memref<16x256xf32, #tpu.memory_space<vmem>>, vector<16x256xf32>
    %13 = arith.truncf %11 : vector<16x512xf32> to vector<16x512xbf16>
    %c0_9 = arith.constant 0 : index
    %c0_10 = arith.constant 0 : index
    %14 = vector.load %arg5[%c0_9, %c0_10] : memref<512x256xbf16, #tpu.memory_space<vmem>>, vector<512x256xbf16>
    %cst_11 = arith.constant dense<0.000000e+00> : vector<16x256xf32>
    %15 = tpu.matmul %13, %14, %cst_11 {dimension_numbers = #tpu.dot_dimension_numbers<[1], [0], [0], [1], [0, 0, 1, 1], [], []>} : vector<16x512xbf16>, vector<512x256xbf16>, vector<16x256xf32> -> vector<16x256xf32>
    %16 = arith.addf %12, %15 : vector<16x256xf32>
    %c0_12 = arith.constant 0 : index
    %c0_13 = arith.constant 0 : index
    %17 = vector.load %arg8[%c0_12, %c0_13] : memref<16x256xf32, #tpu.memory_space<vmem>>, vector<16x256xf32>
    tpu.vector_store %arg8[%c0_12, %c0_13], %16 {strides = array<i32>} : memref<16x256xf32, #tpu.memory_space<vmem>>, vector<16x256xf32>,
    %c1_i32 = arith.constant 1 : i32
    %18 = arith.cmpi eq, %arg1, %c1_i32 : i32
    %19 = arith.extui %18 : i1 to i32
    %c0_i32_14 = arith.constant 0 : i32
    %20 = arith.cmpi ne, %19, %c0_i32_14 : i32
    scf.if %20 {
      %c0_15 = arith.constant 0 : index
      %c0_16 = arith.constant 0 : index
      %21 = vector.load %arg8[%c0_15, %c0_16] : memref<16x256xf32, #tpu.memory_space<vmem>>, vector<16x256xf32>
      %c0_17 = arith.constant 0 : index
      %c0_18 = arith.constant 0 : index
      %22 = vector.load %arg6[%c0_17, %c0_18] : memref<1x256xbf16, #tpu.memory_space<vmem>>, vector<1x256xbf16>
      %23 = arith.extf %22 : vector<1x256xbf16> to vector<1x256xf32>
      %24 = vector.broadcast %23 : vector<1x256xf32> to vector<16x256xf32>
      %25 = arith.addf %21, %24 : vector<16x256xf32>
      %c0_19 = arith.constant 0 : index
      %c0_20 = arith.constant 0 : index
      %26 = vector.load %arg2[%c0_19, %c0_20] : memref<16x256xbf16, #tpu.memory_space<vmem>>, vector<16x256xbf16>
      %27 = arith.extf %26 : vector<16x256xbf16> to vector<16x256xf32>
      %28 = arith.addf %25, %27 : vector<16x256xf32>
      %c0_21 = arith.constant 0 : index
      %c0_22 = arith.constant 0 : index
      %29 = vector.load %arg7[%c0_21, %c0_22] : memref<16x256xf32, #tpu.memory_space<vmem>>, vector<16x256xf32>
      tpu.vector_store %arg7[%c0_21, %c0_22], %28 {strides = array<i32>} : memref<16x256xf32, #tpu.memory_space<vmem>>, vector<16x256xf32>,
    } else {
    }
    return
  }
  func.func @transform_0(%arg0: i32, %arg1: i32) -> (i32, i32) {
    %c0_i32 = arith.constant 0 : i32
    %c0_i32_0 = arith.constant 0 : i32
    return %arg0, %c0_i32 : i32, i32
  }
  func.func @transform_1(%arg0: i32, %arg1: i32) -> (i32, i32) {
    %c0_i32 = arith.constant 0 : i32
    %c0_i32_0 = arith.constant 0 : i32
    return %c0_i32, %arg1 : i32, i32
  }
  func.func @transform_2(%arg0: i32, %arg1: i32) -> (i32, i32) {
    %c0_i32 = arith.constant 0 : i32
    %c0_i32_0 = arith.constant 0 : i32
    return %c0_i32, %arg1 : i32, i32
  }
  func.func @transform_3(%arg0: i32, %arg1: i32) -> (i32, i32) {
    %c0_i32 = arith.constant 0 : i32
    %c0_i32_0 = arith.constant 0 : i32
    return %arg1, %c0_i32 : i32, i32
  }
  func.func @transform_4(%arg0: i32, %arg1: i32) -> (i32, i32) {
    %c0_i32 = arith.constant 0 : i32
    %c0_i32_0 = arith.constant 0 : i32
    %c0_i32_1 = arith.constant 0 : i32
    return %c0_i32, %c0_i32_0 : i32, i32
  }
  func.func @transform_5(%arg0: i32, %arg1: i32) -> (i32, i32) {
    %c0_i32 = arith.constant 0 : i32
    %c0_i32_0 = arith.constant 0 : i32
    return %arg0, %c0_i32 : i32, i32
  }
}

</mosaic_0001>

<bundles_post_ra>
// kernel: tpu_custom_call.1
= control target key start
LH: loop header
LB: loop body
LE: loop exit
PB: predicated region body
PF: predicated region fallthrough
CT: control target
= control target key end

     0   :  { %s2697_s0 = inlined_call_operand.hbm [shape: bf16[16,256], index: 0, kind: input, shape index: {}]   ;;  %s2698_s1 = inlined_call_operand.hbm [shape: bf16[256,1024], index: 1, kind: input, shape index: {}]   ;;  %s2699_s2 = inlined_call_operand.hbm [shape: bf16[1,1024], index: 2, kind: input, shape index: {}]   ;;  %s2700_s3 = inlined_call_operand.hbm [shape: bf16[1024,256], index: 3, kind: input, shape index: {}]   ;;  %s2701_s4 = inlined_call_operand.vmem [shape: bf16[1,256], index: 4, kind: input, shape index: {}]   ;;  %s2702_s5 = inlined_call_operand.hbm [shape: f32[16,256], index: 5, kind: output, shape index: {}]  }
   0x1   :  { %2712 = sst [smem:[#allocation18_spill]] %s2698_s1 }
   0x2   :  { %10 = vsyncpa [#allocation4], 0 }
   0x3   :  { %11 = vsyncpa [#allocation7], 0 }
   0x4   :  { %13 = vsyncpa [#allocation7 + $0x1], 0 }
   0x5   :  { %14 = vsyncpa [#allocation10], 0 }
   0x6   :  { %16 = vsyncpa [#allocation10 + $0x1], 0 }
   0x7   :  { %17 = vsyncpa [#allocation5], 0  ;;  %s2254_s18 = smov 0   ;;  %s2256_s19 = smov 0  }
   0x8   :  { %s2258_s20 = smov 0   ;;  %s2260_s21 = smov 0  }
   0x9   :  { %s2262_s22 = smov 0   ;;  %s2264_s23 = smov 0  }
   0xa LB: > { %s32_s24 = sadd.s32 1, %s2205_s22  ;;  %s68_s25 = sadd.s32 1, %s2197_s20  ;;  %s2209_s23 = sphi %s2264_s23, %s23_s23   ;;  %s2205_s22 = sphi %s2262_s22, %s2734_s22   ;;  %s2201_s21 = sphi %s2260_s21, %s2733_s21   ;;  %s2197_s20 = sphi %s2258_s20, %s2732_s20   ;;  %s2193_s19 = sphi %s2256_s19, %s2731_s19   ;;  %s2189_s18 = sphi %s2254_s18, %s2730_s18  }
   0xb   : > { %p33_p0 = scmp.ge.s32.totalorder %s32_s24, 2  ;;  %p75_p1 = scmp.ne.s32.totalorder %s2197_s20, %s2193_s19 }
   0xc   : > { %p76_p2 = scmp.eq.s32.totalorder %s2209_s23, 0  ;;  %p1746_p4 = scmp.lt.s32.totalorder %s2209_s23, 2 }
   0xd   : > { %s2736_s24 = smov (%p33_p0, %s32_s24), 0  ;;  %s224_s27 = sand.u32 1, %s2209_s23  }
   0xe   : > { %2713 = sst [smem:[#allocation16_spill]] %s2736_s24  ;;  %p77_p3 = por %p76_p2, %p75_p1 }
   0xf   : > { %s65_s26 = ssub.s32 %s2205_s22, %s2736_s24  ;;  %s2296_s28 = sand.u32 1, %s2197_s20  }
  0x10   : > { %p66_p5 = scmp.eq.s32.totalorder %s65_s26, 0  ;;  %s1709_s29 = sshll.u32 %s2205_s22, 8 }
  0x11   : > { %s2703_s6 = sshll.u32 %s2296_s28, 9  ;;  %s2715_s1 = sld [smem:[#allocation18_spill]] }
  0x12   : > { %s2300_s30 = scalar_select %p66_p5, %s2197_s20, %s68_s25  }
  0x13   : > { %p2308_p6 = pnand %p1746_p4, %p77_p3  ;;  %s228_s11 = scalar_lea.vmem [#allocation6], %s2703_s6 }
  0x14   : > { %2714 = sst [smem:[#allocation17_spill]] %s2300_s30  ;;  %s235_s12 = sshll.u32 %s228_s11, 4  ;;  %s2314_s12 = int_to_ptr.vmem [resolvable:$true] %s235_s12 }
  0x15   : > { %s2716_s10 = scalar_select %p2308_p6, 1, 0 }
  0x16   : > { %s2316_s13 = scalar_lea.sflag [#allocation7], %s224_s27  ;;  %p2322_p8 = pneg %p2308_p6 }
  0x17   : > { %s2306_s9 = scalar_lea.hbm %s2715_s1, %s1709_s29  ;;  %s2008_s25 = scalar_lea.hbm %s2715_s1, 16384 }
  0x18   : > { %s2003_s14 = scalar_lea.hbm %s2306_s9, 8192  ;;  %p2009_p11 = scmp.lt.u32.totalorder %s2306_s9, %s2715_s1 }
  0x19   : > { %p2004_p7 = scmp.ne.s32.totalorder %s2306_s9, %s2003_s14  ;;  %p2010_p12 = scmp.lt.u32.totalorder %s2008_s25, %s2003_s14 }
  0x1a   : > { %s2717_s15 = scalar_select %p2322_p8, 1, 0 }
  0x1b   : > { %p2006_p9 = pnand %p2322_p8, %p2004_p7  ;;  %p2011_p13 = por %p2010_p12, %p2009_p11 }
  0x1c   : > { %p2012_p0 = scmp.lt.u32.totalorder %s2003_s14, %s2306_s9 }
  0x1d   : > { %p2007_p10 = pneg %p2006_p9 }
  0x1e   : > { %p2013_p1 = por %p2012_p0, %p2011_p13 }
  0x20   : > { %p2014_p2 = pnand %p2013_p1, %p2007_p10 }
  0x22   : > { %2017 = shalt.err (!%p2014_p2)
}
  0x23   : > { %s2018_s27 = scalar_lea.vmem %s2314_s12, 8192  ;;  %s2211_s7 = smov [#allocation6]  }
  0x24   : > { %p2019_p3 = scmp.ne.s32.totalorder %s2314_s12, %s2018_s27  ;;  %s2023_s8 = sshll.u32 %s2211_s7, 4  ;;  %s2024_s8 = int_to_ptr.vmem [resolvable:$false] %s2023_s8 }
  0x25   : > { %s2025_s11 = scalar_lea.vmem %s2024_s8, 16384  ;;  %p2026_p7 = scmp.lt.s32.totalorder %s2314_s12, %s2024_s8 }
  0x26   : > { %p2021_p4 = pnand %p2019_p3, %p2322_p8  ;;  %p2027_p9 = scmp.lt.s32.totalorder %s2025_s11, %s2018_s27 }
  0x28   : > { %p2022_p5 = pneg %p2021_p4  ;;  %p2028_p11 = por %p2027_p9, %p2026_p7 }
  0x2a   : > { %p2029_p12 = pnand %p2028_p11, %p2022_p5 }
  0x2c   : > { %2032 = shalt.err (!%p2029_p12)
}
  0x2d   : > { %s2212_s14 = smov 512   ;;  %s2213_s16 = smov 256  }
  0x2e   : > { %s2214_s17 = smov 16   ;;  %s2347_s25 = sadd.s32 4294967295, %s2209_s23  }
  0x2f   : > { %1738 = dma.hbm_to_vmem [thread:$0]  (!%p2308_p6), %s2306_s9, 8192, %s2314_s12, %s2316_s13, %s2212_s14, %s2213_s16, %s2214_s17  }
  0x30   : > { %p81_p10 = scmp.ne.s32.totalorder %s2193_s19, %s2189_s18  ;;  %p2705_p13 = scmp.eq.s32.totalorder %s2347_s25, 0 }
  0x31   : > { %p1555_p0 = scmp.ge.s32.totalorder %s2209_s23, 1  ;;  %p191_p1 = scmp.lt.s32.totalorder %s2209_s23, 3 }
  0x32   : > { %p2356_p2 = por %p2705_p13, %p81_p10  ;;  %s2215_s9 = smov [#allocation3]  }
  0x33   : > { %p2360_p3 = pnand %p1555_p0, %p191_p1  ;;  %s207_s12 = sshll.u32 %s2215_s9, 4  ;;  %s2364_s12 = int_to_ptr.vmem [resolvable:$true] %s207_s12 }
  0x34   : > { %s2718_s26 = scalar_select %p2356_p2, 1, 0 }
  0x35   : > { %s2719_s29 = scalar_select %p2360_p3, 1, 0 }
  0x36   : > { %p1731_p4 = pneg %p2360_p3  ;;  %s1561_s18 = sshll.u32 %s2296_s28, 2 }
  0x37   : > { %s1710_s27 = sshll.u32 %s2205_s22, 6  ;;  %s249_s16 = scalar_lea.vmem [#allocation8], %s1561_s18 }
  0x38   : > { %p2372_p5 = pnand %p1731_p4, %p2705_p13  ;;  %s2379_s14 = scalar_lea.hbm %s2699_s2, %s1710_s27 }
  0x39   : > { %s257_s17 = sshll.u32 %s249_s16, 4  ;;  %s2033_s1 = scalar_lea.hbm %s2697_s0, 256  ;;  %s2381_s17 = int_to_ptr.vmem [resolvable:$true] %s257_s17 }
  0x3a   : > { %p2034_p7 = scmp.ne.s32.totalorder %s2697_s0, %s2033_s1  ;;  %p2035_p9 = pneg %p2372_p5 }
  0x3b   : > { %p2040_p10 = scmp.lt.u32.totalorder %s2033_s1, %s2697_s0 }
  0x3c   : > { %p2036_p11 = pnand %p2035_p9, %p2034_p7 }
  0x3e   : > { %p2037_p12 = pneg %p2036_p11 }
  0x40   : > { %p2042_p0 = pnand %p2040_p10, %p2037_p12 }
  0x42   : > { %2045 = shalt.err (!%p2042_p0)
}
  0x43   : > { %s2046_s18 = scalar_lea.vmem %s2364_s12, 256  ;;  %p2054_p2 = scmp.lt.s32.totalorder %s2364_s12, %s2364_s12 }
  0x44   : > { %p2047_p1 = scmp.ne.s32.totalorder %s2364_s12, %s2046_s18  ;;  %p2055_p3 = scmp.lt.s32.totalorder %s2046_s18, %s2046_s18 }
  0x46   : > { %p2049_p4 = pnand %p2047_p1, %p2035_p9  ;;  %p2056_p6 = por %p2055_p3, %p2054_p2 }
  0x48   : > { %p2050_p13 = pneg %p2049_p4 }
  0x4a   : > { %p2057_p8 = pnand %p2056_p6, %p2050_p13 }
  0x4c   : > { %2060 = shalt.err (!%p2057_p8)
}
  0x4d   : > { %s2216_s24 = smov 128   ;;  %s2217_s1 = smov 8  }
  0x4e   : > { %1734 = dma.hbm_to_vmem [thread:$0]  (!%p2372_p5), %s2697_s0, 256, %s2364_s12, [#allocation4], %s2216_s24, %s2216_s24, %s2217_s1  }
  0x4f   : > { %s2061_s27 = scalar_lea.hbm %s2379_s14, 64  ;;  %p2721_p8 = scmp.ne.s32.totalorder %s2717_s15, 0 }
  0x50   : > { %p2062_p6 = scmp.ne.s32.totalorder %s2379_s14, %s2061_s27  ;;  %s2066_s8 = scalar_lea.hbm %s2699_s2, 128 }
  0x51   : > { %p2067_p3 = scmp.lt.u32.totalorder %s2379_s14, %s2699_s2  ;;  %p2068_p7 = scmp.lt.u32.totalorder %s2066_s8, %s2061_s27 }
  0x52   : > { %p2064_p13 = pnand %p2062_p6, %p2721_p8  ;;  %p2070_p11 = scmp.lt.u32.totalorder %s2061_s27, %s2379_s14 }
  0x53   : > { %p2069_p9 = por %p2068_p7, %p2067_p3 }
  0x54   : > { %p2065_p2 = pneg %p2064_p13 }
  0x55   : > { %p2071_p12 = por %p2070_p11, %p2069_p9 }
  0x57   : > { %p2072_p10 = pnand %p2071_p12, %p2065_p2 }
  0x59   : > { %2075 = shalt.err (!%p2072_p10)
}
  0x5a   : > { %s2076_s12 = scalar_lea.vmem %s2381_s17, 64  ;;  %s2218_s7 = smov [#allocation8]  }
  0x5b   : > { %p2077_p5 = scmp.ne.s32.totalorder %s2381_s17, %s2076_s12  ;;  %s2081_s30 = sshll.u32 %s2218_s7, 4  ;;  %s2082_s30 = int_to_ptr.vmem [resolvable:$false] %s2081_s30 }
  0x5c   : > { %s2083_s6 = scalar_lea.vmem %s2082_s30, 128  ;;  %p2084_p4 = scmp.lt.s32.totalorder %s2381_s17, %s2082_s30 }
  0x5d   : > { %p2079_p0 = pnand %p2077_p5, %p2721_p8  ;;  %p2085_p6 = scmp.lt.s32.totalorder %s2083_s6, %s2076_s12 }
  0x5f   : > { %p2080_p1 = pneg %p2079_p0  ;;  %p2086_p13 = por %p2085_p6, %p2084_p4 }
  0x61   : > { %p2087_p3 = pnand %p2086_p13, %p2080_p1 }
  0x63   : > { %2090 = shalt.err (!%p2087_p3)
}
  0x64   : > { %p2722_p2 = scmp.ne.s32.totalorder %s2716_s10, 0  ;;  %s1712_s27 = sshll.u32 %s2205_s22, 13 }
  0x65   : > { %s2723_s16 = sshll.u32 %s2296_s28, 9  ;;  %s2435_s12 = scalar_lea.hbm %s2700_s3, %s1712_s27 }
  0x66   : > { %1741 = dma.hbm_to_vmem [thread:$0]  (!%p2722_p2), %s2379_s14, 64, %s2381_s17, %s2316_s13  }
  0x67   : > { %s268_s9 = scalar_lea.vmem [#allocation9], %s2723_s16  ;;  %s265_s7 = scalar_lea.sflag [#allocation10], %s2296_s28 }
  0x68   : > { %s276_s8 = sshll.u32 %s268_s9, 4  ;;  %s2091_s30 = scalar_lea.hbm %s2435_s12, 8192  ;;  %s2437_s8 = int_to_ptr.vmem [resolvable:$true] %s276_s8 }
  0x69   : > { %p2092_p7 = scmp.ne.s32.totalorder %s2435_s12, %s2091_s30  ;;  %s2096_s17 = scalar_lea.hbm %s2700_s3, 16384 }
  0x6a   : > { %p2097_p12 = scmp.lt.u32.totalorder %s2435_s12, %s2700_s3  ;;  %p2098_p10 = scmp.lt.u32.totalorder %s2096_s17, %s2091_s30 }
  0x6b   : > { %p2094_p9 = pnand %p2092_p7, %p2721_p8  ;;  %p2100_p0 = scmp.lt.u32.totalorder %s2091_s30, %s2435_s12 }
  0x6c   : > { %p2099_p5 = por %p2098_p10, %p2097_p12 }
  0x6d   : > { %p2095_p11 = pneg %p2094_p9 }
  0x6e   : > { %p2101_p1 = por %p2100_p0, %p2099_p5 }
  0x70   : > { %p2102_p4 = pnand %p2101_p1, %p2095_p11 }
  0x72   : > { %2105 = shalt.err (!%p2102_p4)
}
  0x73   : > { %s2106_s27 = scalar_lea.vmem %s2437_s8, 8192  ;;  %s2219_s9 = smov [#allocation9]  }
  0x74   : > { %p2107_p6 = scmp.ne.s32.totalorder %s2437_s8, %s2106_s27  ;;  %s2111_s11 = sshll.u32 %s2219_s9, 4  ;;  %s2112_s11 = int_to_ptr.vmem [resolvable:$false] %s2111_s11 }
  0x75   : > { %s2113_s18 = scalar_lea.vmem %s2112_s11, 16384  ;;  %p2114_p7 = scmp.lt.s32.totalorder %s2437_s8, %s2112_s11 }
  0x76   : > { %p2109_p13 = pnand %p2107_p6, %p2721_p8  ;;  %p2115_p9 = scmp.lt.s32.totalorder %s2113_s18, %s2106_s27 }
  0x78   : > { %p2110_p3 = pneg %p2109_p13  ;;  %p2116_p12 = por %p2115_p9, %p2114_p7 }
  0x7a   : > { %p2117_p10 = pnand %p2116_p12, %p2110_p3 }
  0x7c   : > { %2120 = shalt.err (!%p2117_p10)
}
  0x7d   : > { %1744 = dma.hbm_to_vmem [thread:$0]  (!%p2722_p2), %s2435_s12, 8192, %s2437_s8, %s265_s7, %s2216_s24, %s2216_s24, %s2217_s1  }
  0x7e   : > { %p2724_p8 = scmp.ne.s32.totalorder %s2719_s29, 0 }
  0x7f   : > { %p2725_p11 = scmp.eq.s32.totalorder (!%p2724_p8), %s2347_s25, 0 }
  0x80   : > { %288 = sbr.rel (%p2724_p8) target bundleno = 760 (0x2f8), region = 40 }
  0x87   : > { %2172 = dma.done.wait (%p2725_p11), [#allocation4], 256   ;;  %p2726_p5 = pmov %p2725_p11 }
  0x88   : > { %s294_s10 = sand.u32 1, %s2347_s25   ;;  %s296_s15 = sand.u32 1, %s2193_s19  }
  0x89   : > { %2174 = vsyncadd (%p2726_p5), [#allocation4], 4294967040  ;;  %s1570_s30 = sshll.u32 %s296_s15, 9  ;;  %s295_s13 = scalar_lea.sflag [#allocation7], %s294_s10 }
  0x8a   : > { %s2474_s28 = scalar_lea.vmem [#allocation6], %s1570_s30  ;;  %p2727_p0 = scmp.ne.s32.totalorder %s2718_s26, 0 }
  0x8c   : > { %2176 = dma.done.wait (%p2727_p0), %s295_s13, 8256  }
  0x8d   : > { %2178 = vsyncadd (%p2727_p0), %s295_s13, 4294959040  ;;  %s1571_s29 = sshll.u32 %s296_s15, 2  ;;  %s313_s1 = scalar_lea.sflag [#allocation10], %s296_s15 }
  0x8e   : > { %s2480_s24 = scalar_lea.vmem [#allocation8], %s1571_s29  ;;  %s2482_s8 = scalar_lea.vmem [#allocation9], %s1570_s30 }
  0x8f   : > { %2180 = dma.done.wait (%p2727_p0), %s313_s1, 8192  }
  0x90   : > { %2182 = vsyncadd (%p2727_p0), %s313_s1, 4294959104  ;;  %p1573_p2 = scmp.ne.s32.totalorder %s2201_s21, 0 }
  0x91   : > { %v2220_v0 = vmov (!%p1573_p2), 0.0  }
  0x92   : > { %356 = sbr.rel (%p1573_p2) target bundleno = 153 (0x99), region = 60  ;;  %357 = vst [vmem:[#allocation2] sm:$0xff] (!%p1573_p2), %v2220_v0  ;;  %358 = vst [vmem:[#allocation2 + $0x8] sm:$0xff] (!%p1573_p2), %v2220_v0 }
  0x93   : > { %359 = vst [vmem:[#allocation2 + $0x10] sm:$0xff] (!%p1573_p2), %v2220_v0  ;;  %360 = vst [vmem:[#allocation2 + $0x18] sm:$0xff] (!%p1573_p2), %v2220_v0 }
  0x99 PF: > { %v1808_v1 = vld [vmem:[%s2474_s28 + $0x4] ss:$16 sps:$4 sm:$0xff]   ;;  %v1810_v2 = vld [vmem:[%s2474_s28] ss:$16 sps:$4 sm:$0xff]   ;;  %v1861_v43 = vld [vmem:[%s2474_s28 + $0xc] ss:$16 sps:$4 sm:$0xff]  }
  0x9a   : > { %796 = vmatprep.subr.bf16.mxu1 %v1808_v1  ;;  %v1811_v3 = vld [vmem:[%s2474_s28 + $0x24] ss:$16 sps:$4 sm:$0xff]   ;;  %v1813_v4 = vld [vmem:[%s2474_s28 + $0x20] ss:$16 sps:$4 sm:$0xff]   ;;  %v1859_v47 = vld [vmem:[%s2474_s28 + $0x8] ss:$16 sps:$4 sm:$0xff]  }
  0x9b   : > { %797 = vmatpush1.bf16.msra.mxu1 %v1810_v2  ;;  %v1814_v5 = vld [vmem:[%s2474_s28 + $0x44] ss:$16 sps:$4 sm:$0xff]   ;;  %v1816_v6 = vld [vmem:[%s2474_s28 + $0x40] ss:$16 sps:$4 sm:$0xff]   ;;  %v1864_v48 = vld [vmem:[%s2474_s28 + $0x2c] ss:$16 sps:$4 sm:$0xff]  }
  0x9c   : > { %798 = vmatprep.subr.bf16.mxu1 %v1811_v3  ;;  %v1817_v7 = vld [vmem:[%s2474_s28 + $0x64] ss:$16 sps:$4 sm:$0xff]   ;;  %v1819_v8 = vld [vmem:[%s2474_s28 + $0x60] ss:$16 sps:$4 sm:$0xff]   ;;  %v1862_v51 = vld [vmem:[%s2474_s28 + $0x28] ss:$16 sps:$4 sm:$0xff]  }
  0x9d   : > { %v1820_v9 = vld [vmem:[%s2474_s28 + $0x84] ss:$16 sps:$4 sm:$0xff]   ;;  %v1822_v10 = vld [vmem:[%s2474_s28 + $0x80] ss:$16 sps:$4 sm:$0xff]   ;;  %v1867_v52 = vld [vmem:[%s2474_s28 + $0x4c] ss:$16 sps:$4 sm:$0xff]  }
  0x9e   : > { %v1823_v11 = vld [vmem:[%s2474_s28 + $0xa4] ss:$16 sps:$4 sm:$0xff]   ;;  %v1825_v12 = vld [vmem:[%s2474_s28 + $0xa0] ss:$16 sps:$4 sm:$0xff]   ;;  %v1865_v55 = vld [vmem:[%s2474_s28 + $0x48] ss:$16 sps:$4 sm:$0xff]  }
  0x9f   : > { %799 = vmatpush1.bf16.msra.mxu1 %v1813_v4  ;;  %v1826_v13 = vld [vmem:[%s2474_s28 + $0xc4] ss:$16 sps:$4 sm:$0xff]   ;;  %v1828_v15 = vld [vmem:[%s2474_s28 + $0xc0] ss:$16 sps:$4 sm:$0xff]   ;;  %v1870_v56 = vld [vmem:[%s2474_s28 + $0x6c] ss:$16 sps:$4 sm:$0xff]  }
  0xa0   : > { %800 = vmatprep.subr.bf16.mxu1 %v1814_v5  ;;  %v2502_v14 = vld [vmem:[#allocation3 + $0x4] ss:$8 sps:$4 sm:$0xff]   ;;  %v1831_v17 = vld [vmem:[%s2474_s28 + $0xe0] ss:$16 sps:$4 sm:$0xff]   ;;  %v1868_v59 = vld [vmem:[%s2474_s28 + $0x68] ss:$16 sps:$4 sm:$0xff]  }
  0xa1   : > { %v1829_v16 = vld [vmem:[%s2474_s28 + $0xe4] ss:$16 sps:$4 sm:$0xff]   ;;  %828 = vmatprep.mubr.bf16.mxu1 %v2502_v14  ;;  %v1834_v19 = vld [vmem:[%s2474_s28 + $0x100] ss:$16 sps:$4 sm:$0xff]   ;;  %v1873_v60 = vld [vmem:[%s2474_s28 + $0x8c] ss:$16 sps:$4 sm:$0xff]  }
  0xa2   : > { %v1832_v18 = vld [vmem:[%s2474_s28 + $0x104] ss:$16 sps:$4 sm:$0xff]   ;;  %v1837_v21 = vld [vmem:[%s2474_s28 + $0x120] ss:$16 sps:$4 sm:$0xff]   ;;  %v1871_v63 = vld [vmem:[%s2474_s28 + $0x88] ss:$16 sps:$4 sm:$0xff]  }
  0xa3   : > { %801 = vmatpush1.bf16.msra.mxu1 %v1816_v6  ;;  %v1835_v20 = vld [vmem:[%s2474_s28 + $0x124] ss:$16 sps:$4 sm:$0xff]   ;;  %v1840_v23 = vld [vmem:[%s2474_s28 + $0x140] ss:$16 sps:$4 sm:$0xff]   ;;  %v1876_v0 = vld [vmem:[%s2474_s28 + $0xac] ss:$16 sps:$4 sm:$0xff]  }
  0xa4   : > { %802 = vmatprep.subr.bf16.mxu1 %v1817_v7  ;;  %v1838_v22 = vld [vmem:[%s2474_s28 + $0x144] ss:$16 sps:$4 sm:$0xff]   ;;  %v1843_v25 = vld [vmem:[%s2474_s28 + $0x160] ss:$16 sps:$4 sm:$0xff]   ;;  %v1874_v3 = vld [vmem:[%s2474_s28 + $0xa8] ss:$16 sps:$4 sm:$0xff]  }
  0xa5   : > { %v1841_v24 = vld [vmem:[%s2474_s28 + $0x164] ss:$16 sps:$4 sm:$0xff]   ;;  %v1909_v28 = vld [vmem:[%s2482_s8] ss:$8 sps:$4 sm:$0xff]   ;;  %v1912_v32 = vld [vmem:[%s2482_s8 + $0x10] ss:$8 sps:$4 sm:$0xff]  }
  0xa6   : > { %v1844_v26 = vld [vmem:[%s2474_s28 + $0x184] ss:$16 sps:$4 sm:$0xff]   ;;  %v1846_v29 = vld [vmem:[%s2474_s28 + $0x180] ss:$16 sps:$4 sm:$0xff]   ;;  %v1879_v4 = vld [vmem:[%s2474_s28 + $0xcc] ss:$16 sps:$4 sm:$0xff]  }
  0xa7   : > { %803 = vmatpush1.bf16.msra.mxu1 %v1819_v8  ;;  %v1907_v27 = vld [vmem:[%s2482_s8 + $0x4] ss:$8 sps:$4 sm:$0xff]   ;;  %v1910_v30 = vld [vmem:[%s2482_s8 + $0x14] ss:$8 sps:$4 sm:$0xff]   ;;  %v1849_v34 = vld [vmem:[%s2474_s28 + $0x1a0] ss:$16 sps:$4 sm:$0xff]  }
  0xa8   : > { %804 = vmatprep.subr.bf16.mxu1 %v1820_v9  ;;  %1282 = vmatprep.subr.bf16.mxu0 %v1907_v27  ;;  %v1847_v31 = vld [vmem:[%s2474_s28 + $0x1a4] ss:$16 sps:$4 sm:$0xff]   ;;  %v1915_v36 = vld [vmem:[%s2482_s8 + $0x20] ss:$8 sps:$4 sm:$0xff]   ;;  %v1918_v40 = vld [vmem:[%s2482_s8 + $0x30] ss:$8 sps:$4 sm:$0xff]  }
  0xa9   : > { %1283 = vmatpush1.bf16.msra.mxu0 %v1909_v28  ;;  %v1913_v33 = vld [vmem:[%s2482_s8 + $0x24] ss:$8 sps:$4 sm:$0xff]   ;;  %v1916_v37 = vld [vmem:[%s2482_s8 + $0x34] ss:$8 sps:$4 sm:$0xff]   ;;  %v1852_v38 = vld [vmem:[%s2474_s28 + $0x1c0] ss:$16 sps:$4 sm:$0xff]  }
  0xaa   : > { %1284 = vmatprep.subr.bf16.mxu0 %v1910_v30  ;;  %v1850_v35 = vld [vmem:[%s2474_s28 + $0x1c4] ss:$16 sps:$4 sm:$0xff]   ;;  %v1855_v42 = vld [vmem:[%s2474_s28 + $0x1e0] ss:$16 sps:$4 sm:$0xff]   ;;  %v1877_v7 = vld [vmem:[%s2474_s28 + $0xc8] ss:$16 sps:$4 sm:$0xff]  }
  0xab   : > { %805 = vmatpush1.bf16.msra.mxu1 %v1822_v10  ;;  %v1853_v39 = vld [vmem:[%s2474_s28 + $0x1e4] ss:$16 sps:$4 sm:$0xff]   ;;  %v1921_v44 = vld [vmem:[%s2482_s8 + $0x40] ss:$8 sps:$4 sm:$0xff]   ;;  %v1924_v49 = vld [vmem:[%s2482_s8 + $0x50] ss:$8 sps:$4 sm:$0xff]  }
  0xac   : > { %806 = vmatprep.subr.bf16.mxu1 %v1823_v11  ;;  %v1919_v41 = vld [vmem:[%s2482_s8 + $0x44] ss:$8 sps:$4 sm:$0xff]   ;;  %v2535_v45 = vld [vmem:[#allocation3] ss:$8 sps:$4 sm:$0xff]   ;;  %v1922_v46 = vld [vmem:[%s2482_s8 + $0x54] ss:$8 sps:$4 sm:$0xff]  }
  0xad   : > { %1285 = vmatpush1.bf16.msra.mxu0 %v1912_v32  ;;  %v1925_v50 = vld [vmem:[%s2482_s8 + $0x64] ss:$8 sps:$4 sm:$0xff]   ;;  %v1927_v53 = vld [vmem:[%s2482_s8 + $0x60] ss:$8 sps:$4 sm:$0xff]   ;;  %v1928_v54 = vld [vmem:[%s2482_s8 + $0x74] ss:$8 sps:$4 sm:$0xff]  }
  0xae   : > { %1286 = vmatprep.subr.bf16.mxu0 %v1913_v33  ;;  %v1930_v57 = vld [vmem:[%s2482_s8 + $0x70] ss:$8 sps:$4 sm:$0xff]   ;;  %v1931_v58 = vld [vmem:[%s2482_s8 + $0x84] ss:$8 sps:$4 sm:$0xff]   ;;  %v1933_v61 = vld [vmem:[%s2482_s8 + $0x80] ss:$8 sps:$4 sm:$0xff]  }
  0xaf   : > { %807 = vmatpush1.bf16.msra.mxu1 %v1825_v12  ;;  %v1934_v62 = vld [vmem:[%s2482_s8 + $0x94] ss:$8 sps:$4 sm:$0xff]   ;;  %v1936_v1 = vld [vmem:[%s2482_s8 + $0x90] ss:$8 sps:$4 sm:$0xff]   ;;  %v1937_v2 = vld [vmem:[%s2482_s8 + $0xa4] ss:$8 sps:$4 sm:$0xff]  }
  0xb0   : > { %808 = vmatprep.subr.bf16.mxu1 %v1826_v13  ;;  %v1939_v5 = vld [vmem:[%s2482_s8 + $0xa0] ss:$8 sps:$4 sm:$0xff]   ;;  %v1940_v6 = vld [vmem:[%s2482_s8 + $0xb4] ss:$8 sps:$4 sm:$0xff]   ;;  %v1942_v9 = vld [vmem:[%s2482_s8 + $0xb0] ss:$8 sps:$4 sm:$0xff]  }
  0xb1   : > { %1287 = vmatpush1.bf16.msra.mxu0 %v1915_v36  ;;  %v1882_v8 = vld [vmem:[%s2474_s28 + $0xec] ss:$16 sps:$4 sm:$0xff]   ;;  %v1880_v11 = vld [vmem:[%s2474_s28 + $0xe8] ss:$16 sps:$4 sm:$0xff]   ;;  %v430_v36 = vlaneseq  ;;  %p1704_p1 = scmp.ne.s32.totalorder %s2201_s21, 1 }
  0xb2   : > { %1288 = vmatprep.subr.bf16.mxu0 %v1916_v37  ;;  %v1943_v10 = vld [vmem:[%s2482_s8 + $0xc4] ss:$8 sps:$4 sm:$0xff]   ;;  %v1945_v13 = vld [vmem:[%s2482_s8 + $0xc0] ss:$8 sps:$4 sm:$0xff]   ;;  %v1948_v30 = vld [vmem:[%s2482_s8 + $0xd0] ss:$8 sps:$4 sm:$0xff]  }
  0xb3   : > { %809 = vmatpush1.bf16.msra.mxu1 %v1828_v15  ;;  %v1885_v12 = vld [vmem:[%s2474_s28 + $0x10c] ss:$16 sps:$4 sm:$0xff]   ;;  %v1883_v15 = vld [vmem:[%s2474_s28 + $0x108] ss:$16 sps:$4 sm:$0xff]   ;;  %v2594_v37 = vshrl.u32 %v430_v36, 7 }
  0xb4   : > { %810 = vmatprep.subr.bf16.mxu1 %v1829_v16  ;;  %v1888_v16 = vld [vmem:[%s2474_s28 + $0x12c] ss:$16 sps:$4 sm:$0xff]   ;;  %v1901_v27 = vld [vmem:[%s2474_s28 + $0x1c8] ss:$16 sps:$4 sm:$0xff]  }
  0xb5   : > { %1289 = vmatpush1.bf16.msra.mxu0 %v1918_v40  ;;  %v1906_v28 = vld [vmem:[%s2474_s28 + $0x1ec] ss:$16 sps:$4 sm:$0xff]   ;;  %v1951_v32 = vld [vmem:[%s2482_s8 + $0xe0] ss:$8 sps:$4 sm:$0xff]   ;;  %v2600_v40 = vsub.s32 0, %v2594_v37 }
  0xb6   : > { %1290 = vmatprep.subr.bf16.mxu0 %v1919_v41  ;;  %v1952_v33 = vld [vmem:[%s2482_s8 + $0xf4] ss:$8 sps:$4 sm:$0xff]   ;;  %v436_v41 = vsub.s32 2, %v2594_v37 }
  0xb7   : > { %811 = vmatpush1.bf16.msra.mxu1 %v1831_v17  ;;  %v1886_v17 = vld [vmem:[%s2474_s28 + $0x128] ss:$16 sps:$4 sm:$0xff]  }
  0xb8   : > { %812 = vmatprep.subr.bf16.mxu1 %v1832_v18  ;;  %v1891_v18 = vld [vmem:[%s2474_s28 + $0x14c] ss:$16 sps:$4 sm:$0xff]  }
  0xb9   : > { %1291 = vmatpush1.bf16.msra.mxu0 %v1921_v44 }
  0xba   : > { %1292 = vmatprep.subr.bf16.mxu0 %v1922_v46 }
  0xbb   : > { %813 = vmatpush1.bf16.msra.mxu1 %v1834_v19  ;;  %v1889_v19 = vld [vmem:[%s2474_s28 + $0x148] ss:$16 sps:$4 sm:$0xff]  }
  0xbc   : > { %814 = vmatprep.subr.bf16.mxu1 %v1835_v20  ;;  %v1894_v20 = vld [vmem:[%s2474_s28 + $0x16c] ss:$16 sps:$4 sm:$0xff]  }
  0xbd   : > { %1293 = vmatpush1.bf16.msra.mxu0 %v1924_v49 }
  0xbe   : > { %1294 = vmatprep.subr.bf16.mxu0 %v1925_v50 }
  0xbf   : > { %815 = vmatpush1.bf16.msra.mxu1 %v1837_v21  ;;  %v1892_v21 = vld [vmem:[%s2474_s28 + $0x168] ss:$16 sps:$4 sm:$0xff]  }
  0xc0   : > { %816 = vmatprep.subr.bf16.mxu1 %v1838_v22  ;;  %v1897_v22 = vld [vmem:[%s2474_s28 + $0x18c] ss:$16 sps:$4 sm:$0xff]  }
  0xc1   : > { %1295 = vmatpush1.bf16.msra.mxu0 %v1927_v53 }
  0xc2   : > { %1296 = vmatprep.subr.bf16.mxu0 %v1928_v54 }
  0xc3   : > { %817 = vmatpush1.bf16.msra.mxu1 %v1840_v23  ;;  %v1895_v23 = vld [vmem:[%s2474_s28 + $0x188] ss:$16 sps:$4 sm:$0xff]  }
  0xc4   : > { %818 = vmatprep.subr.bf16.mxu1 %v1841_v24  ;;  %v1900_v24 = vld [vmem:[%s2474_s28 + $0x1ac] ss:$16 sps:$4 sm:$0xff]  }
  0xc5   : > { %1297 = vmatpush1.bf16.msra.mxu0 %v1930_v57 }
  0xc6   : > { %1298 = vmatprep.subr.bf16.mxu0 %v1931_v58 }
  0xc7   : > { %819 = vmatpush1.bf16.msra.mxu1 %v1843_v25  ;;  %v1898_v25 = vld [vmem:[%s2474_s28 + $0x1a8] ss:$16 sps:$4 sm:$0xff]  }
  0xc8   : > { %820 = vmatprep.subr.bf16.mxu1 %v1844_v26  ;;  %v1903_v26 = vld [vmem:[%s2474_s28 + $0x1cc] ss:$16 sps:$4 sm:$0xff]  }
  0xc9   : > { %1299 = vmatpush1.bf16.msra.mxu0 %v1933_v61  ;;  %v1960_v61 = vld [vmem:[%s2482_s8 + $0x114] ss:$8 sps:$4 sm:$0xff]  }
  0xca   : > { %1300 = vmatprep.subr.bf16.mxu0 %v1934_v62  ;;  %v1958_v62 = vld [vmem:[%s2482_s8 + $0x110] ss:$8 sps:$4 sm:$0xff]  }
  0xcb   : > { %821 = vmatpush1.bf16.msra.mxu1 %v1846_v29  ;;  %v1904_v29 = vld [vmem:[%s2474_s28 + $0x1e8] ss:$16 sps:$4 sm:$0xff]  }
  0xcc   : > { %822 = vmatprep.subr.bf16.mxu1 %v1847_v31  ;;  %v1949_v31 = vld [vmem:[%s2482_s8 + $0xe4] ss:$8 sps:$4 sm:$0xff]  }
  0xcd   : > { %1301 = vmatpush1.bf16.msra.mxu0 %v1936_v1  ;;  %v1966_v1 = vld [vmem:[%s2482_s8 + $0x134] ss:$8 sps:$4 sm:$0xff]  }
  0xce   : > { %1302 = vmatprep.subr.bf16.mxu0 %v1937_v2  ;;  %v1964_v2 = vld [vmem:[%s2482_s8 + $0x130] ss:$8 sps:$4 sm:$0xff]  }
  0xcf   : > { %823 = vmatpush1.bf16.msra.mxu1 %v1849_v34  ;;  %v1954_v34 = vld [vmem:[%s2482_s8 + $0xf0] ss:$8 sps:$4 sm:$0xff]  }
  0xd0   : > { %824 = vmatprep.subr.bf16.mxu1 %v1850_v35  ;;  %v1957_v35 = vld [vmem:[%s2482_s8 + $0x104] ss:$8 sps:$4 sm:$0xff]  }
  0xd1   : > { %1303 = vmatpush1.bf16.msra.mxu0 %v1939_v5  ;;  %v1972_v5 = vld [vmem:[%s2482_s8 + $0x154] ss:$8 sps:$4 sm:$0xff]  }
  0xd2   : > { %1304 = vmatprep.subr.bf16.mxu0 %v1940_v6  ;;  %v1970_v6 = vld [vmem:[%s2482_s8 + $0x150] ss:$8 sps:$4 sm:$0xff]  }
  0xd3   : > { %825 = vmatpush1.bf16.msra.mxu1 %v1852_v38  ;;  %v427_v38 = vld [vmem:[%s2480_s24] sm:$0xf] }
  0xd4   : > { %826 = vmatprep.subr.bf16.mxu1 %v1853_v39  ;;  %v2597_v39 = vunpack.c.l.bf16 %v427_v38 }
  0xd5   : > { %1305 = vmatpush1.bf16.msra.mxu0 %v1942_v9  ;;  %v1978_v9 = vld [vmem:[%s2482_s8 + $0x174] ss:$8 sps:$4 sm:$0xff]  }
  0xd6   : > { %1306 = vmatprep.subr.bf16.mxu0 %v1943_v10  ;;  %v1976_v10 = vld [vmem:[%s2482_s8 + $0x170] ss:$8 sps:$4 sm:$0xff]  }
  0xd7   : > { %827 = vmatpush1.bf16.msra.mxu1 %v1855_v42  ;;  %v433_v42 = vrot.slane %v2597_v39, %v2600_v40 }
  0xd8   : > { %839 = vmatprep.subr.bf16.mxu1 %v1861_v43  ;;  %v437_v43 = vrot.slane %v2597_v39, %v436_v41 }
  0xd9   : > { %1307 = vmatpush1.bf16.msra.mxu0 %v1945_v13  ;;  %v453_v44 = vrot.slane %v433_v42, %v2600_v40  ;;  %v1984_v13 = vld [vmem:[%s2482_s8 + $0x194] ss:$8 sps:$4 sm:$0xff]  }
  0xda   : > { %829 = vmatmul.mubr.bf16.vlgmr.msra.gmra.mrb[0].mxu1 %v2535_v45 }
  0xdb   : > { %840 = vmatpush1.bf16.msra.mxu1 %v1859_v47  ;;  %871 = vmatprep.mubr.bf16.mxu1 %v2502_v14  ;;  %v1946_v14 = vld [vmem:[%s2482_s8 + $0xd4] ss:$8 sps:$4 sm:$0xff]  }
  0xdc   : > { %841 = vmatprep.subr.bf16.mxu1 %v1864_v48  ;;  %1308 = vmatprep.subr.bf16.mxu0 %v1946_v14  ;;  %v1982_v14 = vld [vmem:[%s2482_s8 + $0x190] ss:$8 sps:$4 sm:$0xff]  }
  0xdd   : > { %1309 = vmatpush1.bf16.msra.mxu0 %v1948_v30 }
  0xde   : > { %1310 = vmatprep.subr.bf16.mxu0 %v1949_v31  ;;  %v1997_v31 = vld [vmem:[%s2482_s8 + $0x1e0] ss:$8 sps:$4 sm:$0xff]  }
  0xdf   : > { %842 = vmatpush1.bf16.msra.mxu1 %v1862_v51 }
  0xe0   : > { %843 = vmatprep.subr.bf16.mxu1 %v1867_v52 }
  0xe1   : > { %1311 = vmatpush1.bf16.msra.mxu0 %v1951_v32 }
  0xe2   : > { %1312 = vmatprep.subr.bf16.mxu0 %v1952_v33 }
  0xe3   : > { %844 = vmatpush1.bf16.msra.mxu1 %v1865_v55 }
  0xe4   : > { %845 = vmatprep.subr.bf16.mxu1 %v1870_v56 }
  0xe5   : > { %1313 = vmatpush1.bf16.msra.mxu0 %v1954_v34  ;;  %v2002_v34 = vld [vmem:[%s2482_s8 + $0x1f4] ss:$8 sps:$4 sm:$0xff]  }
  0xe6   : > { %1325 = vmatprep.subr.bf16.mxu0 %v1957_v35 }
  0xe7   : > { %846 = vmatpush1.bf16.msra.mxu1 %v1868_v59 }
  0xe8   : > { %847 = vmatprep.subr.bf16.mxu1 %v1873_v60  ;;  %v1955_v60 = vld [vmem:[%s2482_s8 + $0x100] ss:$8 sps:$4 sm:$0xff]  }
  0xeb   : > { %848 = vmatpush1.bf16.msra.mxu1 %v1871_v63  ;;  %v1963_v63 = vld [vmem:[%s2482_s8 + $0x124] ss:$8 sps:$4 sm:$0xff]  }
  0xec   : > { %849 = vmatprep.subr.bf16.mxu1 %v1876_v0  ;;  %v1961_v0 = vld [vmem:[%s2482_s8 + $0x120] ss:$8 sps:$4 sm:$0xff]  }
  0xef   : > { %850 = vmatpush1.bf16.msra.mxu1 %v1874_v3  ;;  %v1969_v3 = vld [vmem:[%s2482_s8 + $0x144] ss:$8 sps:$4 sm:$0xff]  }
  0xf0   : > { %851 = vmatprep.subr.bf16.mxu1 %v1879_v4  ;;  %v1967_v4 = vld [vmem:[%s2482_s8 + $0x140] ss:$8 sps:$4 sm:$0xff]  }
  0xf3   : > { %852 = vmatpush1.bf16.msra.mxu1 %v1877_v7  ;;  %v1975_v7 = vld [vmem:[%s2482_s8 + $0x164] ss:$8 sps:$4 sm:$0xff]  }
  0xf4   : > { %853 = vmatprep.subr.bf16.mxu1 %v1882_v8  ;;  %v1973_v8 = vld [vmem:[%s2482_s8 + $0x160] ss:$8 sps:$4 sm:$0xff]  }
  0xf7   : > { %854 = vmatpush1.bf16.msra.mxu1 %v1880_v11  ;;  %v1981_v11 = vld [vmem:[%s2482_s8 + $0x184] ss:$8 sps:$4 sm:$0xff]  }
  0xf8   : > { %855 = vmatprep.subr.bf16.mxu1 %v1885_v12  ;;  %v1979_v12 = vld [vmem:[%s2482_s8 + $0x180] ss:$8 sps:$4 sm:$0xff]  }
  0xfb   : > { %856 = vmatpush1.bf16.msra.mxu1 %v1883_v15  ;;  %v1987_v15 = vld [vmem:[%s2482_s8 + $0x1a4] ss:$8 sps:$4 sm:$0xff]  }
  0xfc   : > { %857 = vmatprep.subr.bf16.mxu1 %v1888_v16  ;;  %v1985_v16 = vld [vmem:[%s2482_s8 + $0x1a0] ss:$8 sps:$4 sm:$0xff]  }
  0xff   : > { %858 = vmatpush1.bf16.msra.mxu1 %v1886_v17  ;;  %v1990_v17 = vld [vmem:[%s2482_s8 + $0x1b4] ss:$8 sps:$4 sm:$0xff]  }
 0x100   : > { %859 = vmatprep.subr.bf16.mxu1 %v1891_v18  ;;  %v1988_v18 = vld [vmem:[%s2482_s8 + $0x1b0] ss:$8 sps:$4 sm:$0xff]  }
 0x103   : > { %860 = vmatpush1.bf16.msra.mxu1 %v1889_v19  ;;  %v1993_v19 = vld [vmem:[%s2482_s8 + $0x1c4] ss:$8 sps:$4 sm:$0xff]  }
 0x104   : > { %861 = vmatprep.subr.bf16.mxu1 %v1894_v20  ;;  %v440_v20 = vsub.s32 4, %v2594_v37 }
 0x107   : > { %862 = vmatpush1.bf16.msra.mxu1 %v1892_v21  ;;  %v444_v21 = vsub.s32 6, %v2594_v37 }
 0x108   : > { %863 = vmatprep.subr.bf16.mxu1 %v1897_v22  ;;  %v1991_v22 = vld [vmem:[%s2482_s8 + $0x1c0] ss:$8 sps:$4 sm:$0xff]  }
 0x10b   : > { %864 = vmatpush1.bf16.msra.mxu1 %v1895_v23  ;;  %v1996_v23 = vld [vmem:[%s2482_s8 + $0x1d4] ss:$8 sps:$4 sm:$0xff]  }
 0x10c   : > { %865 = vmatprep.subr.bf16.mxu1 %v1900_v24  ;;  %v441_v24 = vrot.slane %v2597_v39, %v440_v20 }
 0x10f   : > { %866 = vmatpush1.bf16.msra.mxu1 %v1898_v25  ;;  %v445_v25 = vrot.slane %v2597_v39, %v444_v21 }
 0x110   : > { %867 = vmatprep.subr.bf16.mxu1 %v1903_v26  ;;  %v1994_v26 = vld [vmem:[%s2482_s8 + $0x1d0] ss:$8 sps:$4 sm:$0xff]  }
 0x113   : > { %868 = vmatpush1.bf16.msra.mxu1 %v1901_v27  ;;  %v461_v27 = vrot.slane %v441_v24, %v2600_v40 }
 0x114   : > { %869 = vmatprep.subr.bf16.mxu1 %v1906_v28  ;;  %v1999_v28 = vld [vmem:[%s2482_s8 + $0x1e4] ss:$8 sps:$4 sm:$0xff]  }
 0x117   : > { %870 = vmatpush1.bf16.msra.mxu1 %v1904_v29  ;;  %v465_v29 = vrot.slane %v445_v25, %v2600_v40 }
 0x11a   : > { %872 = vmatmul.mubr.bf16.vlgmr.msra.gmra.mrb[4].mxu1 %v2535_v45  ;;  %v457_v45 = vrot.slane %v437_v43, %v2600_v40  ;;  %v2000_v43 = vld [vmem:[%s2482_s8 + $0x1f0] ss:$8 sps:$4 sm:$0xff]  }
 0x1ad   : > { %v830_v46 = vpop.f32.mrb[0].mxu1 }
 0x1ae   : > { %v831_v47 = vadd.f32 %v830_v46, %v453_v44  ;;  %v832_v48 = vpop.f32.mrb[1].mxu1 }
 0x1af   : > { %v833_v49 = vadd.f32 %v832_v48, %v457_v45  ;;  %v834_v50 = vpop.f32.mrb[2].mxu1 }
 0x1b0   : > { %v882_v51 = vmax.f32 %v831_v47, 0.0  ;;  %v835_v52 = vadd.f32 %v834_v50, %v453_v44  ;;  %v836_v53 = vpop.f32.mrb[3].mxu1  ;;  %v890_v50 = vld [vmem:[#allocation2] sm:$0xff] }
 0x1b1   : > { %v837_v54 = vadd.f32 %v836_v53, %v457_v45  ;;  %v883_v56 = vmax.f32 %v833_v49, 0.0  ;;  %v892_v53 = vld [vmem:[#allocation2 + $0x10] sm:$0xff] }
 0x1b2   : > { %v886_v55 = vmax.f32 %v835_v52, 0.0 }
 0x1b3   : > { %v887_v57 = vmax.f32 %v837_v54, 0.0 }
 0x1b4   : > { %v894_v58 = vpack.c.bf16 %v886_v55, %v882_v51  ;;  %v891_v51 = vld [vmem:[#allocation2 + $0x8] sm:$0xff] }
 0x1b5   : > { %v895_v59 = vpack.c.bf16 %v887_v57, %v883_v56  ;;  %v893_v56 = vld [vmem:[#allocation2 + $0x18] sm:$0xff] }
 0x1b7   : > { %1314 = vmatprep.mubr.bf16.mxu0 %v895_v59 }
 0x1b8   : > { %1315 = vmatmul.mubr.bf16.vlgmr.msra.gmra.mrb[0].mxu0 %v894_v58 }
 0x1b9   : > { %1326 = vmatpush1.bf16.msra.mxu0 %v1955_v60 }
 0x1ba   : > { %1327 = vmatprep.subr.bf16.mxu0 %v1960_v61 }
 0x1bd   : > { %1328 = vmatpush1.bf16.msra.mxu0 %v1958_v62  ;;  %v1384_v62 = vld [vmem:[%s2701_s4] sm:$0x3] (!%p1704_p1) }
 0x1be   : > { %1329 = vmatprep.subr.bf16.mxu0 %v1963_v63  ;;  %v1385_v63 = vunpack.c.l.bf16 (!%p1704_p1), %v1384_v62 }
 0x1c1   : > { %1330 = vmatpush1.bf16.msra.mxu0 %v1961_v0  ;;  %v1409_v0 = vld [vmem:[#allocation3] sm:$0xff] (!%p1704_p1) }
 0x1c2   : > { %1331 = vmatprep.subr.bf16.mxu0 %v1966_v1  ;;  %v1410_v1 = vld [vmem:[#allocation3 + $0x8] sm:$0xff] (!%p1704_p1) }
 0x1c5   : > { %1332 = vmatpush1.bf16.msra.mxu0 %v1964_v2 }
 0x1c6   : > { %1333 = vmatprep.subr.bf16.mxu0 %v1969_v3  ;;  %v1390_v3 = vrot.slane (!%p1704_p1), %v1385_v63, %v2600_v40 }
 0x1c9   : > { %1334 = vmatpush1.bf16.msra.mxu0 %v1967_v4  ;;  %v1394_v4 = vrot.slane (!%p1704_p1), %v1385_v63, %v436_v41 }
 0x1ca   : > { %1335 = vmatprep.subr.bf16.mxu0 %v1972_v5  ;;  %v1411_v5 = vunpack.c.l.bf16 (!%p1704_p1), %v1409_v0 }
 0x1cd   : > { %1336 = vmatpush1.bf16.msra.mxu0 %v1970_v6 }
 0x1ce   : > { %1337 = vmatprep.subr.bf16.mxu0 %v1975_v7  ;;  %v1412_v7 = vunpack.c.h.bf16 (!%p1704_p1), %v1409_v0 }
 0x1d1   : > { %1338 = vmatpush1.bf16.msra.mxu0 %v1973_v8 }
 0x1d2   : > { %1339 = vmatprep.subr.bf16.mxu0 %v1978_v9 }
 0x1d5   : > { %1340 = vmatpush1.bf16.msra.mxu0 %v1976_v10  ;;  %v1400_v10 = vrot.slane (!%p1704_p1), %v1390_v3, %v2600_v40 }
 0x1d6   : > { %1341 = vmatprep.subr.bf16.mxu0 %v1981_v11  ;;  %v1404_v11 = vrot.slane (!%p1704_p1), %v1394_v4, %v2600_v40 }
 0x1d9   : > { %1342 = vmatpush1.bf16.msra.mxu0 %v1979_v12  ;;  %v1413_v12 = vunpack.c.l.bf16 (!%p1704_p1), %v1410_v1 }
 0x1da   : > { %1343 = vmatprep.subr.bf16.mxu0 %v1984_v13  ;;  %v1414_v13 = vunpack.c.h.bf16 (!%p1704_p1), %v1410_v1 }
 0x1dd   : > { %1344 = vmatpush1.bf16.msra.mxu0 %v1982_v14 }
 0x1de   : > { %1345 = vmatprep.subr.bf16.mxu0 %v1987_v15 }
 0x1e1   : > { %1346 = vmatpush1.bf16.msra.mxu0 %v1985_v16 }
 0x1e2   : > { %1347 = vmatprep.subr.bf16.mxu0 %v1990_v17 }
 0x1e5   : > { %1348 = vmatpush1.bf16.msra.mxu0 %v1988_v18 }
 0x1e6   : > { %1349 = vmatprep.subr.bf16.mxu0 %v1993_v19 }
 0x1e9   : > { %1350 = vmatpush1.bf16.msra.mxu0 %v1991_v22 }
 0x1ea   : > { %1351 = vmatprep.subr.bf16.mxu0 %v1996_v23 }
 0x1ed   : > { %v873_v30 = vpop.f32.mrb[4].mxu1  ;;  %1352 = vmatpush1.bf16.msra.mxu0 %v1994_v26 }
 0x1ee   : > { %v874_v32 = vadd.f32 %v873_v30, %v461_v27  ;;  %v875_v33 = vpop.f32.mrb[5].mxu1  ;;  %1353 = vmatprep.subr.bf16.mxu0 %v1999_v28 }
 0x1ef   : > { %v876_v35 = vadd.f32 %v875_v33, %v465_v29  ;;  %v877_v36 = vpop.f32.mrb[6].mxu1 }
 0x1f0   : > { %v878_v38 = vadd.f32 %v877_v36, %v461_v27  ;;  %v879_v39 = vpop.f32.mrb[7].mxu1  ;;  %v884_v44 = vmax.f32 %v874_v32, 0.0 }
 0x1f1   : > { %v880_v42 = vadd.f32 %v879_v39, %v465_v29  ;;  %1354 = vmatpush1.bf16.msra.mxu0 %v1997_v31  ;;  %v885_v46 = vmax.f32 %v876_v35, 0.0 }
 0x1f2   : > { %v888_v45 = vmax.f32 %v878_v38, 0.0  ;;  %1355 = vmatprep.subr.bf16.mxu0 %v2002_v34 }
 0x1f3   : > { %v889_v47 = vmax.f32 %v880_v42, 0.0 }
 0x1f4   : > { %v896_v48 = vpack.c.bf16 %v888_v45, %v884_v44 }
 0x1f5   : > { %v897_v49 = vpack.c.bf16 %v889_v47, %v885_v46  ;;  %1356 = vmatpush1.bf16.msra.mxu0 %v2000_v43 }
 0x1f7   : > { %1357 = vmatprep.mubr.bf16.mxu0 %v897_v49 }
 0x1f8   : > { %1358 = vmatmul.mubr.bf16.vlgmr.msra.gmra.mrb[0].mxu0 %v896_v48 }
 0x2cb   : > { %v1359_v52 = vpop.f32.mrb[0].mxu0  ;;  %1379 = sbr.rel (%p1704_p1) target bundleno = 734 (0x2de), region = 64 }
 0x2cc   : > { %v1368_v54 = vadd.f32 %v1359_v52, %v890_v50  ;;  %v1361_v55 = vpop.f32.mrb[1].mxu0 }
 0x2cd   : > { %v1369_v57 = vadd.f32 %v1361_v55, %v891_v51  ;;  %v1363_v58 = vpop.f32.mrb[2].mxu0 }
 0x2ce   : > { %1372 = vst [vmem:[#allocation2] sm:$0xff] %v1368_v54  ;;  %v1370_v59 = vadd.f32 %v1363_v58, %v892_v53  ;;  %v1365_v60 = vpop.f32.mrb[3].mxu0 }
 0x2cf   : > { %1373 = vst [vmem:[#allocation2 + $0x8] sm:$0xff] %v1369_v57  ;;  %v1371_v61 = vadd.f32 %v1365_v60, %v893_v56 }
 0x2d0   : > { %1374 = vst [vmem:[#allocation2 + $0x10] sm:$0xff] %v1370_v59 }
 0x2d1   : > { %1375 = vst [vmem:[#allocation2 + $0x18] sm:$0xff] %v1371_v61 }
 0x2d5   : > { %v1380_v2 = vld [vmem:[#allocation2] sm:$0xff] }
 0x2d6   : > { %v1381_v6 = vld [vmem:[#allocation2 + $0x8] sm:$0xff]  ;;  %v1405_v14 = vadd.f32 %v1400_v10, %v1380_v2 }
 0x2d7   : > { %v1382_v8 = vld [vmem:[#allocation2 + $0x10] sm:$0xff]  ;;  %v1406_v15 = vadd.f32 %v1404_v11, %v1381_v6 }
 0x2d8   : > { %v1383_v9 = vld [vmem:[#allocation2 + $0x18] sm:$0xff]  ;;  %v1407_v16 = vadd.f32 %v1400_v10, %v1382_v8  ;;  %v1415_v18 = vadd.f32 %v1411_v5, %v1405_v14 }
 0x2d9   : > { %v1408_v17 = vadd.f32 %v1404_v11, %v1383_v9  ;;  %v1416_v19 = vadd.f32 %v1412_v7, %v1406_v15 }
 0x2da   : > { %v1417_v20 = vadd.f32 %v1413_v12, %v1407_v16  ;;  %1419 = vst [vmem:[#allocation11] sm:$0xff] %v1415_v18 }
 0x2db   : > { %v1418_v37 = vadd.f32 %v1414_v13, %v1408_v17  ;;  %1420 = vst [vmem:[#allocation11 + $0x8] sm:$0xff] %v1416_v19 }
 0x2dc   : > { %1421 = vst [vmem:[#allocation11 + $0x10] sm:$0xff] %v1417_v20 }
 0x2dd   : > { %1422 = vst [vmem:[#allocation11 + $0x18] sm:$0xff] %v1418_v37 }
 0x2de PF: > { %p1748_p4 = scmp.eq.s32.totalorder %s2347_s25, 1  ;;  %s2221_s21 = smov [#allocation11]  }
 0x2df   : > { %s1433_s7 = sshll.u32 %s2221_s21, 4  ;;  %s1434_s7 = int_to_ptr.vmem [resolvable:$true] %s1433_s7 }
 0x2e0   : > { %s2121_s14 = scalar_lea.vmem %s1434_s7, 512  ;;  %p2128_p7 = scmp.lt.s32.totalorder %s1434_s7, %s1434_s7 }
 0x2e1   : > { %p2122_p6 = scmp.ne.s32.totalorder %s1434_s7, %s2121_s14  ;;  %p2129_p9 = scmp.lt.s32.totalorder %s2121_s14, %s2121_s14 }
 0x2e3   : > { %p2123_p13 = pnand %p2122_p6, %p1748_p4  ;;  %p2130_p12 = por %p2129_p9, %p2128_p7 }
 0x2e5   : > { %p2124_p3 = pneg %p2123_p13 }
 0x2e7   : > { %p2131_p10 = pnand %p2130_p12, %p2124_p3 }
 0x2e9   : > { %2134 = shalt.err (!%p2131_p10)
}
 0x2ea   : > { %s2135_s16 = scalar_lea.hbm %s2702_s5, 512 }
 0x2eb   : > { %p2136_p8 = scmp.ne.s32.totalorder %s2702_s5, %s2135_s16  ;;  %p2141_p0 = scmp.lt.u32.totalorder %s2135_s16, %s2702_s5 }
 0x2ed   : > { %p2137_p11 = pnand %p2136_p8, %p1748_p4 }
 0x2ef   : > { %p2138_p5 = pneg %p2137_p11 }
 0x2f1   : > { %p2143_p2 = pnand %p2141_p0, %p2138_p5 }
 0x2f3   : > { %2146 = shalt.err (!%p2143_p2)
}
 0x2f4   : > { %s2222_s10 = smov 256   ;;  %s2223_s15 = smov 16  }
 0x2f5   : > { %1728 = dma.vmem_to_hbm [thread:$0]  (%p1748_p4), %s1434_s7, 512, %s2702_s5, [#allocation5], %s2222_s10, %s2222_s10, %s2223_s15  }
 0x2f6   : > { %2184 = dma.done.wait (%p1748_p4), [#allocation5], 512  }
 0x2f7   : > { %2186 = vsyncadd (%p1748_p4), [#allocation5], 4294966784 }
 0x2f8 PF: > { %s23_s23 = sadd.s32 1, %s2209_s23   ;;  %s2728_s28 = sld [smem:[#allocation17_spill]] }
 0x2f9   : > { %p20_p1 = scmp.ge.s32.totalorder %s23_s23, 4   ;;  %s2729_s29 = sld [smem:[#allocation16_spill]] }
 0x2fa   : > { %s2730_s18 = smov %s2193_s19  ;;  %s2731_s19 = smov %s2197_s20 }
 0x2fb   : > { %s2733_s21 = smov %s2205_s22  ;;  %22 = sbr.rel (!%p20_p1) target bundleno = 10 (0xa), region = 116 }
 0x2fe   : > { %s2732_s20 = smov %s2728_s28 }
 0x2ff   : > { %s2734_s22 = smov %s2729_s29 }
 0x302   :  { %1449 = vsyncpa [#allocation4], 1 }
 0x303   :  { %1451 = vsyncpa [#allocation4 + $0x1], 1 }
 0x304   :  { %1452 = vsyncpa [#allocation7], 1 }
 0x305   :  { %1454 = vsyncpa [#allocation7 + $0x1], 1 }
 0x306   :  { %1455 = vsyncpa [#allocation10], 1 }
 0x307   :  { %1457 = vsyncpa [#allocation10 + $0x1], 1 }
 0x308   :  { %1458 = vsyncpa [#allocation5], 1 }
 0x309   :  { %1460 = vsyncpa [#allocation5 + $0x1], 1 }

</bundles_post_ra>
